<compile_context>
chip_gen: v7x
topology: tpu7x:2x2x1
jax: 0.10.0
libtpu: 0.0.40
codegen_flags: <defaults>
</compile_context>

<pallas_src>
import functools

import jax
import jax.numpy as jnp
from jax.experimental import pallas as pl
from jax.experimental.pallas import tpu as pltpu


LANE = 128                     # lane width: pad output columns for unmasked stores
VMEM_BUDGET_BYTES = 8 * 1024 * 1024   # budget for double-buffered x + out tiles


def mlp_kernel(x_ref, w1_ref, b1_ref, w2_ref, b2_ref, w3_ref, b3_ref, o_ref):
    # Stage 1: Linear(input_dim, 32) + ReLU   (Dropout -> identity in eval)
    h1 = jnp.dot(x_ref[...], w1_ref[...], preferred_element_type=jnp.float32)
    h1 = jnp.maximum(h1 + b1_ref[...], 0.0)
    # Stage 2: Linear(32, 16) + ReLU          (Dropout -> identity in eval)
    h2 = jnp.dot(h1.astype(jnp.bfloat16), w2_ref[...],
                 preferred_element_type=jnp.float32)
    h2 = jnp.maximum(h2 + b2_ref[...], 0.0)
    # Stage 3: Linear(16, out_pad) -> logits (padded columns are exactly zero)
    logits = jnp.dot(h2.astype(jnp.bfloat16), w3_ref[...],
                     preferred_element_type=jnp.float32)
    o_ref[...] = (logits + b3_ref[...]).astype(o_ref.dtype)


@functools.partial(jax.jit, static_argnames=("tile_b",))
def mlp_forward(x, params, tile_b=2048):
    w1, b1, w2, b2, w3, b3 = params
    batch, input_dim = x.shape
    h1_dim = w1.shape[1]
    h2_dim = w2.shape[1]
    out_dim = w3.shape[1]
    out_pad = max(LANE, pl.cdiv(out_dim, LANE) * LANE)

    # --- choose the batch tile --------------------------------------------
    # Bytes streamed per row (x bf16 in + out f32 padded), double-buffered.
    per_row_bytes = 2 * (input_dim * 2 + out_pad * 4)
    budget_rows = max(8, (VMEM_BUDGET_BYTES // per_row_bytes) // 8 * 8)
    tile_b = min(tile_b, budget_rows)                       # fit VMEM budget
    tile_b = min(tile_b, max(8, pl.cdiv(batch, 8) * 8))     # clamp to batch
    padded_batch = pl.cdiv(batch, tile_b) * tile_b
    if padded_batch != batch:
        x = jnp.pad(x, ((0, padded_batch - batch), (0, 0)))

    # --- operand prep -------------------------------------------------------
    # bf16 for the bandwidth-dominant operands; biases stay f32.
    x_bf = x.astype(jnp.bfloat16)
    w1_bf = w1.astype(jnp.bfloat16)
    w2_bf = w2.astype(jnp.bfloat16)
    # Zero-pad final layer to lane-dense 128 output columns.
    w3_bf = jnp.pad(w3, ((0, 0), (0, out_pad - out_dim))).astype(jnp.bfloat16)
    b3_p = jnp.pad(b3, ((0, 0), (0, out_pad - out_dim))).astype(jnp.float32)

    grid = (padded_batch // tile_b,)

    flops = 2 * padded_batch * (input_dim * h1_dim + h1_dim * h2_dim
                                + h2_dim * out_pad)
    bytes_accessed = (
        padded_batch * input_dim * 2            # x (bf16)
        + padded_batch * out_pad * 4            # out (f32, padded)
        + (input_dim * h1_dim + h1_dim * h2_dim + h2_dim * out_pad) * 2  # weights
        + (h1_dim + h2_dim + out_pad) * 4       # biases
    )

    out_padded = pl.pallas_call(
        mlp_kernel,
        out_shape=jax.ShapeDtypeStruct((padded_batch, out_pad), jnp.float32),
        grid=grid,
        in_specs=[
            pl.BlockSpec((tile_b, input_dim), lambda i: (i, 0)),   # x: tiled
            pl.BlockSpec((input_dim, h1_dim), lambda i: (0, 0)),   # w1: resident
            pl.BlockSpec((1, h1_dim), lambda i: (0, 0)),           # b1
            pl.BlockSpec((h1_dim, h2_dim), lambda i: (0, 0)),      # w2
            pl.BlockSpec((1, h2_dim), lambda i: (0, 0)),           # b2
            pl.BlockSpec((h2_dim, out_pad), lambda i: (0, 0)),     # w3 (padded)
            pl.BlockSpec((1, out_pad), lambda i: (0, 0)),          # b3 (padded)
        ],
        out_specs=pl.BlockSpec((tile_b, out_pad), lambda i: (i, 0)),
        compiler_params=pltpu.CompilerParams(
            dimension_semantics=("parallel",),  # shards batch across TCs on v7x
        ),
        cost_estimate=pl.CostEstimate(
            flops=flops, bytes_accessed=bytes_accessed, transcendentals=0),
    )(x_bf, w1_bf, b1, w2_bf, b2, w3_bf, b3_p)

    # Slice back to the true batch / output width.
    return out_padded[:batch, :out_dim]


def init_linear(key, fan_in, fan_out):
    """PyTorch nn.Linear default init: U(-1/sqrt(fan_in), 1/sqrt(fan_in))."""
    kw, kb = jax.random.split(key)
    bound = 1.0 / jnp.sqrt(jnp.asarray(fan_in, jnp.float32))
    # Stored as (in_features, out_features) == PyTorch weight.T
    w = jax.random.uniform(kw, (fan_in, fan_out), jnp.float32, -bound, bound)
    b = jax.random.uniform(kb, (1, fan_out), jnp.float32, -bound, bound)
    return w, b


def reference_forward(x, params):
    w1, b1, w2, b2, w3, b3 = params
    h1 = jnp.maximum(x @ w1 + b1, 0.0)
    h2 = jnp.maximum(h1 @ w2 + b2, 0.0)
    return h2 @ w3 + b3


if __name__ == "__main__":
    # boards dict -> 9 output classes; pick a small synthetic input_dim.
    input_dim = 64
    hidden1, hidden2 = 32, 16
    output_dim = 9
    batch = 8

    key = jax.random.PRNGKey(0)
    kx, k1, k2, k3 = jax.random.split(key, 4)

    x = jax.random.normal(kx, (batch, input_dim), jnp.float32)
    w1, b1 = init_linear(k1, input_dim, hidden1)
    w2, b2 = init_linear(k2, hidden1, hidden2)
    w3, b3 = init_linear(k3, hidden2, output_dim)
    params = (w1, b1, w2, b2, w3, b3)

    # TODO(synk): Dropout is implemented as eval-mode identity; training-mode
    # stochastic masking would need pltpu.prng_random_bits in-kernel.
    logits = jax.block_until_ready(mlp_forward(x, params))

    ref = reference_forward(x, params)
    assert logits.shape == (batch, output_dim)
    # bf16 inputs/weights with f32 accumulation -> relaxed tolerance vs f32 ref.
    assert jnp.allclose(logits, ref, atol=5e-2, rtol=5e-2), (
        float(jnp.max(jnp.abs(logits - ref))))

    print("KERNEL_OK")
</pallas_src>

<mosaic_0001>
module attributes {stable_mosaic.version = 11 : i64} {
  func.func @mlp_kernel(%arg0: i32, %arg1: memref<8x64xbf16, #tpu.memory_space<vmem>>, %arg2: memref<64x32xbf16, #tpu.memory_space<vmem>>, %arg3: memref<1x32xf32, #tpu.memory_space<vmem>>, %arg4: memref<32x16xbf16, #tpu.memory_space<vmem>>, %arg5: memref<1x16xf32, #tpu.memory_space<vmem>>, %arg6: memref<16x128xbf16, #tpu.memory_space<vmem>>, %arg7: memref<1x128xf32, #tpu.memory_space<vmem>>, %arg8: memref<8x128xf32, #tpu.memory_space<vmem>>) attributes {dimension_semantics = [#tpu.dimension_semantics<parallel>], iteration_bounds = array<i64: 1>, scalar_prefetch = 0 : i64, scratch_operands = 0 : i64, tpu.core_type = #tpu.core_type<tc>, window_params = [{transform_indices = @transform_0, window_bounds = array<i64: 8, 64>}, {pipeline_mode = #tpu.pipeline_mode<synchronous>, transform_indices = @transform_1, window_bounds = array<i64: 64, 32>}, {pipeline_mode = #tpu.pipeline_mode<synchronous>, transform_indices = @transform_2, window_bounds = array<i64: 1, 32>}, {pipeline_mode = #tpu.pipeline_mode<synchronous>, transform_indices = @transform_3, window_bounds = array<i64: 32, 16>}, {pipeline_mode = #tpu.pipeline_mode<synchronous>, transform_indices = @transform_4, window_bounds = array<i64: 1, 16>}, {pipeline_mode = #tpu.pipeline_mode<synchronous>, transform_indices = @transform_5, window_bounds = array<i64: 16, 128>}, {pipeline_mode = #tpu.pipeline_mode<synchronous>, transform_indices = @transform_6, window_bounds = array<i64: 1, 128>}, {transform_indices = @transform_7, window_bounds = array<i64: 8, 128>}]} {
    %c0 = arith.constant 0 : index
    %c0_0 = arith.constant 0 : index
    %0 = vector.load %arg1[%c0, %c0_0] : memref<8x64xbf16, #tpu.memory_space<vmem>>, vector<8x64xbf16>
    %c0_1 = arith.constant 0 : index
    %c0_2 = arith.constant 0 : index
    %1 = vector.load %arg2[%c0_1, %c0_2] : memref<64x32xbf16, #tpu.memory_space<vmem>>, vector<64x32xbf16>
    %cst = arith.constant dense<0.000000e+00> : vector<8x32xf32>
    %2 = tpu.matmul %0, %1, %cst {dimension_numbers = #tpu.dot_dimension_numbers<[1], [0], [0], [1], [0, 0, 1, 1], [], []>} : vector<8x64xbf16>, vector<64x32xbf16>, vector<8x32xf32> -> vector<8x32xf32>
    %c0_3 = arith.constant 0 : index
    %c0_4 = arith.constant 0 : index
    %3 = vector.load %arg3[%c0_3, %c0_4] : memref<1x32xf32, #tpu.memory_space<vmem>>, vector<1x32xf32>
    %4 = vector.broadcast %3 : vector<1x32xf32> to vector<8x32xf32>
    %5 = arith.addf %2, %4 : vector<8x32xf32>
    %cst_5 = arith.constant 0.000000e+00 : f32
    %6 = vector.broadcast %cst_5 : f32 to vector<8x32xf32>
    %7 = arith.maximumf %5, %6 : vector<8x32xf32>
    %8 = arith.truncf %7 : vector<8x32xf32> to vector<8x32xbf16>
    %c0_6 = arith.constant 0 : index
    %c0_7 = arith.constant 0 : index
    %9 = vector.load %arg4[%c0_6, %c0_7] : memref<32x16xbf16, #tpu.memory_space<vmem>>, vector<32x16xbf16>
    %cst_8 = arith.constant dense<0.000000e+00> : vector<8x16xf32>
    %10 = tpu.matmul %8, %9, %cst_8 {dimension_numbers = #tpu.dot_dimension_numbers<[1], [0], [0], [1], [0, 0, 1, 1], [], []>} : vector<8x32xbf16>, vector<32x16xbf16>, vector<8x16xf32> -> vector<8x16xf32>
    %c0_9 = arith.constant 0 : index
    %c0_10 = arith.constant 0 : index
    %11 = vector.load %arg5[%c0_9, %c0_10] : memref<1x16xf32, #tpu.memory_space<vmem>>, vector<1x16xf32>
    %12 = vector.broadcast %11 : vector<1x16xf32> to vector<8x16xf32>
    %13 = arith.addf %10, %12 : vector<8x16xf32>
    %cst_11 = arith.constant 0.000000e+00 : f32
    %14 = vector.broadcast %cst_11 : f32 to vector<8x16xf32>
    %15 = arith.maximumf %13, %14 : vector<8x16xf32>
    %16 = arith.truncf %15 : vector<8x16xf32> to vector<8x16xbf16>
    %c0_12 = arith.constant 0 : index
    %c0_13 = arith.constant 0 : index
    %17 = vector.load %arg6[%c0_12, %c0_13] : memref<16x128xbf16, #tpu.memory_space<vmem>>, vector<16x128xbf16>
    %cst_14 = arith.constant dense<0.000000e+00> : vector<8x128xf32>
    %18 = tpu.matmul %16, %17, %cst_14 {dimension_numbers = #tpu.dot_dimension_numbers<[1], [0], [0], [1], [0, 0, 1, 1], [], []>} : vector<8x16xbf16>, vector<16x128xbf16>, vector<8x128xf32> -> vector<8x128xf32>
    %c0_15 = arith.constant 0 : index
    %c0_16 = arith.constant 0 : index
    %19 = vector.load %arg7[%c0_15, %c0_16] : memref<1x128xf32, #tpu.memory_space<vmem>>, vector<1x128xf32>
    %20 = vector.broadcast %19 : vector<1x128xf32> to vector<8x128xf32>
    %21 = arith.addf %18, %20 : vector<8x128xf32>
    %c0_17 = arith.constant 0 : index
    %c0_18 = arith.constant 0 : index
    %22 = vector.load %arg8[%c0_17, %c0_18] : memref<8x128xf32, #tpu.memory_space<vmem>>, vector<8x128xf32>
    tpu.vector_store %arg8[%c0_17, %c0_18], %21 {strides = array<i32>} : memref<8x128xf32, #tpu.memory_space<vmem>>, vector<8x128xf32>,
    return
  }
  func.func @transform_0(%arg0: i32) -> (i32, i32) {
    %c0_i32 = arith.constant 0 : i32
    %c0_i32_0 = arith.constant 0 : i32
    return %arg0, %c0_i32 : i32, i32
  }
  func.func @transform_1(%arg0: i32) -> (i32, i32) {
    %c0_i32 = arith.constant 0 : i32
    %c0_i32_0 = arith.constant 0 : i32
    %c0_i32_1 = arith.constant 0 : i32
    return %c0_i32, %c0_i32_0 : i32, i32
  }
  func.func @transform_2(%arg0: i32) -> (i32, i32) {
    %c0_i32 = arith.constant 0 : i32
    %c0_i32_0 = arith.constant 0 : i32
    %c0_i32_1 = arith.constant 0 : i32
    return %c0_i32, %c0_i32_0 : i32, i32
  }
  func.func @transform_3(%arg0: i32) -> (i32, i32) {
    %c0_i32 = arith.constant 0 : i32
    %c0_i32_0 = arith.constant 0 : i32
    %c0_i32_1 = arith.constant 0 : i32
    return %c0_i32, %c0_i32_0 : i32, i32
  }
  func.func @transform_4(%arg0: i32) -> (i32, i32) {
    %c0_i32 = arith.constant 0 : i32
    %c0_i32_0 = arith.constant 0 : i32
    %c0_i32_1 = arith.constant 0 : i32
    return %c0_i32, %c0_i32_0 : i32, i32
  }
  func.func @transform_5(%arg0: i32) -> (i32, i32) {
    %c0_i32 = arith.constant 0 : i32
    %c0_i32_0 = arith.constant 0 : i32
    %c0_i32_1 = arith.constant 0 : i32
    return %c0_i32, %c0_i32_0 : i32, i32
  }
  func.func @transform_6(%arg0: i32) -> (i32, i32) {
    %c0_i32 = arith.constant 0 : i32
    %c0_i32_0 = arith.constant 0 : i32
    %c0_i32_1 = arith.constant 0 : i32
    return %c0_i32, %c0_i32_0 : i32, i32
  }
  func.func @transform_7(%arg0: i32) -> (i32, i32) {
    %c0_i32 = arith.constant 0 : i32
    %c0_i32_0 = arith.constant 0 : i32
    return %arg0, %c0_i32 : i32, i32
  }
}

</mosaic_0001>

<bundles_post_ra>
// kernel: mlp_forward.1
= control target key start
LH: loop header
LB: loop body
LE: loop exit
PB: predicated region body
PF: predicated region fallthrough
CT: control target
= control target key end

     0   :  { %v340_v1 = vmov 0.0   ;;  %vm341_vm0 = vmmov 0   ;;  %s431_s0 = inlined_call_operand.vmem [shape: bf16[8,64], index: 0, kind: input, shape index: {}]   ;;  %s432_s1 = inlined_call_operand.vmem [shape: bf16[64,32], index: 1, kind: input, shape index: {}]   ;;  %s433_s2 = inlined_call_operand.vmem [shape: f32[1,32], index: 2, kind: input, shape index: {}]   ;;  %s434_s3 = inlined_call_operand.vmem [shape: bf16[32,16], index: 3, kind: input, shape index: {}]   ;;  %s435_s4 = inlined_call_operand.vmem [shape: f32[1,16], index: 4, kind: input, shape index: {}]   ;;  %s436_s5 = inlined_call_operand.vmem [shape: bf16[16,128], index: 5, kind: input, shape index: {}]   ;;  %s437_s6 = inlined_call_operand.vmem [shape: f32[1,128], index: 6, kind: input, shape index: {}]   ;;  %s438_s7 = inlined_call_operand.hbm [shape: f32[8,128], index: 7, kind: output, shape index: {}]  }
   0x1   :  { %v309_v0 = vld [vmem:[%s432_s1] sm:$0xff]   ;;  %280 = vmatprep.subr.bf16.mxu0 %v340_v1  ;;  %292 = vmatprep.subr.bf16.mxu1 %v340_v1  ;;  %v310_v2 = vld [vmem:[%s432_s1 + $0x8] sm:$0xff]   ;;  %v311_v3 = vld [vmem:[%s432_s1 + $0x10] sm:$0xff]  }
   0x2   :  { %281 = vmatpush3.bf16.msra.mxu0 %v309_v0  ;;  %288 = vmatprep.mubr.msk.bf16.mxu0 %vm341_vm0, %v340_v1 }
   0x3   :  { %282 = vmatprep.subr.bf16.mxu0 %v340_v1  ;;  %296 = vmatprep.mubr.msk.bf16.mxu1 %vm341_vm0, %v340_v1 }
   0x6   :  { %283 = vmatpush3.bf16.msra.mxu0 %v310_v2 }
   0x7   :  { %12 = vsyncpa [#allocation3], 0  ;;  %284 = vmatprep.subr.bf16.mxu0 %v340_v1  ;;  %v312_v4 = vld [vmem:[%s432_s1 + $0x18] sm:$0xff]   ;;  %v28_v5 = vld [vmem:[%s431_s0] sm:$0xf]  ;;  %vm68_vm1 = vcmask 523264  }
   0x8   :  { %v313_v6 = vld [vmem:[%s434_s3] sm:$0xff]   ;;  %v314_v7 = vld [vmem:[%s434_s3 + $0x8] sm:$0xff]   ;;  %vm137_vm2 = vcmask 261120   ;;  %vm198_vm3 = vcmask 130048   ;;  %s342_s18 = smov [#allocation2]  }
   0x9   :  { %293 = vmatpush3.bf16.msra.mxu1 %v313_v6  ;;  %v257_v8 = vld [vmem:[%s433_s2] ss:$0 sm:$0xff]  ;;  %s249_s19 = sshll.u32 %s342_s18, 4  ;;  %s250_s19 = int_to_ptr.vmem [resolvable:$true] %s249_s19 }
   0xa   :  { %285 = vmatpush3.bf16.msra.mxu0 %v311_v3  ;;  %294 = vmatprep.subr.bf16.mxu1 %v340_v1  ;;  %v315_v15 = vld [vmem:[%s436_s5] sm:$0xff]   ;;  %p321_p1 = scmp.lt.s32.totalorder %s250_s19, %s250_s19 }
   0xb   :  { %286 = vmatprep.subr.bf16.mxu0 %v340_v1  ;;  %v263_v17 = vld [vmem:[%s435_s4] ss:$0 sm:$0xff]  ;;  %s316_s4 = scalar_lea.vmem %s250_s19, 128 }
   0xc   :  { %v267_v25 = vld [vmem:[%s437_s6] ss:$0 sm:$0xff]  ;;  %p317_p0 = scmp.ne.s32.totalorder %s250_s19, %s316_s4  ;;  %p322_p2 = scmp.lt.s32.totalorder %s316_s4, %s316_s4 }
   0xd   :  { %295 = vmatpush3.bf16.msra.mxu1 %v314_v7 }
   0xe   :  { %287 = vmatpush3.bf16.msra.mxu0 %v312_v4  ;;  %300 = vmatprep.subr.bf16.mxu1 %v340_v1  ;;  %p323_p3 = por %p322_p2, %p321_p1 }
  0x10   :  { %p324_p4 = pnand %p323_p3, %p317_p0 }
  0x11   :  { %289 = vmatmul.mubr.msk.bf16.vlgmr.msra.gmra.mrb[0].mxu0 %vm68_vm1, %v28_v5 }
  0xe4   :  { %v106_v9 = vpop.f32.mrb[0].mxu0 }
  0xe5   :  { %v107_v10 = vadd.f32 %v257_v8, %v106_v9  ;;  %v290_v11 = vpop.f32.mrb[1].mxu0 }
  0xe6   :  { %v109_v12 = vpop.f32.mrb[2].mxu0 }
  0xe7   :  { %v112_v13 = vmax.f32 %v107_v10, 0.0  ;;  %v291_v14 = vpop.f32.mrb[3].mxu0 }
  0xe9   :  { %v113_v16 = vpack.c.bf16 %v112_v13, %v112_v13 }
  0xeb   :  { %297 = vmatmul.mubr.msk.bf16.vlgmr.msra.gmra.mrb[0].mxu1 %vm137_vm2, %v113_v16 }
  0xec   :  { %301 = vmatpush3.bf16.msra.mxu1 %v315_v15  ;;  %302 = vmatprep.mubr.msk.bf16.mxu1 %vm341_vm0, %v340_v1 }
 0x1be   :  { %v175_v18 = vpop.f32.mrb[0].mxu1 }
 0x1bf   :  { %v176_v19 = vadd.f32 %v263_v17, %v175_v18  ;;  %v298_v20 = vpop.f32.mrb[1].mxu1 }
 0x1c0   :  { %v178_v21 = vpop.f32.mrb[2].mxu1 }
 0x1c1   :  { %v181_v22 = vmax.f32 %v176_v19, 0.0  ;;  %v299_v23 = vpop.f32.mrb[3].mxu1 }
 0x1c3   :  { %v182_v24 = vpack.c.bf16 %v181_v22, %v181_v22 }
 0x1c5   :  { %303 = vmatmul.mubr.msk.bf16.vlgmr.msra.gmra.mrb[4].mxu1 %vm198_vm3, %v182_v24 }
 0x298   :  { %v236_v26 = vpop.f32.mrb[4].mxu1 }
 0x299   :  { %v237_v27 = vadd.f32 %v267_v25, %v236_v26  ;;  %v304_v28 = vpop.f32.mrb[5].mxu1 }
 0x29a   :  { %v239_v29 = vpop.f32.mrb[6].mxu1 }
 0x29b   :  { %242 = vst [vmem:[#allocation2] sm:$0xff] %v237_v27  ;;  %v305_v30 = vpop.f32.mrb[7].mxu1 }
 0x29c   :  { %327 = shalt.err (!%p324_p4)
}
 0x29d   :  { %s328_s6 = scalar_lea.hbm %s438_s7, 128 }
 0x29e   :  { %p329_p5 = scmp.ne.s32.totalorder %s438_s7, %s328_s6  ;;  %p332_p6 = scmp.lt.u32.totalorder %s328_s6, %s438_s7 }
 0x2a0   :  { %p334_p7 = pnand %p332_p6, %p329_p5 }
 0x2a2   :  { %337 = shalt.err (!%p334_p7)
}
 0x2a3   :  { %252 = dma.vmem_to_hbm [thread:$0]  %s250_s19, 128, %s438_s7, [#allocation3]  }
 0x2a4   :  { %338 = dma.done.wait [#allocation3], 128  }
 0x2a5   :  { %339 = vsyncadd [#allocation3], 4294967168 }
 0x2a6   :  { %256 = vsyncpa [#allocation3], 1 }

</bundles_post_ra>
